<compile_context>
chip_gen: v7x
topology: tpu7x:2x2x1
jax: 0.10.0
libtpu: 0.0.40
codegen_flags: <defaults>
</compile_context>

<pallas_src>
import jax
import jax.numpy as jnp
from jax.experimental import pallas as pl
from jax.experimental.pallas import tpu as pltpu

EPS = 1e-5  # nn.LayerNorm default


def _add_norm_kernel(x_ref, y_ref, g_ref, b_ref, o_ref):
    # x_ref, y_ref, o_ref: (tile_rows, dim); g_ref, b_ref: (1, dim)
    s = x_ref[...].astype(jnp.float32) + y_ref[...].astype(jnp.float32)
    mean = jnp.mean(s, axis=-1, keepdims=True)
    mean_sq = jnp.mean(s * s, axis=-1, keepdims=True)
    # Biased variance (divide by dim), matching nn.LayerNorm.  One-pass form
    # E[s^2] - E[s]^2, clamped against tiny negatives from cancellation.
    var = jnp.maximum(mean_sq - mean * mean, 0.0)
    inv = jax.lax.rsqrt(var + EPS)  # EUP op -> overlaps with VPU/ld-st work
    out = (s - mean) * inv * g_ref[...].astype(jnp.float32) \
          + b_ref[...].astype(jnp.float32)
    o_ref[...] = out.astype(o_ref.dtype)


def _round_up(x, m):
    return (x + m - 1) // m * m


def _pick_tile_rows(n_rows, dim, itemsize, row_align):
    """Largest row tile whose double-buffered footprint fits the VMEM budget."""
    # 3 streamed arrays (x, y, out), double-buffered by the pipeline -> 6 tiles.
    vmem_target = 40 * 1024 * 1024  # inside v7x's 64 MiB VMEM with headroom
    per_row_bytes = 6 * dim * itemsize
    tile = vmem_target // max(per_row_bytes, 1)
    tile = min(tile, 1024)  # 512-1024 rows already saturates HBM roofline
    tile = max(row_align, (tile // row_align) * row_align)
    # Don't make the tile bigger than the (row-aligned) problem itself.
    tile = min(tile, _round_up(n_rows, row_align))
    return int(tile)


def add_norm(x, y, gamma, beta, *, tile_rows=None):
    assert x.shape == y.shape
    dim = x.shape[-1]
    orig_shape = x.shape
    x2 = x.reshape(-1, dim)
    y2 = y.reshape(-1, dim)
    n_rows = x2.shape[0]

    itemsize = jnp.dtype(x.dtype).itemsize
    row_align = 16 if itemsize < 4 else 8  # bf16 packs (16,128) per vreg
    if tile_rows is None:
        tile_rows = _pick_tile_rows(n_rows, dim, itemsize, row_align)

    g2 = gamma.reshape(1, dim)
    b2 = beta.reshape(1, dim)

    # No input padding: Pallas handles the ragged last block; OOB output rows
    # are never written back to HBM.
    grid = (pl.cdiv(n_rows, tile_rows),)

    # Scoped-VMEM budget: double-buffered x/y/out tiles + params + slack.
    tile_bytes = tile_rows * dim * itemsize
    vmem_limit = int(min(56 * 1024 * 1024,
                         6 * tile_bytes + 4 * dim * 4 + 8 * 1024 * 1024))

    out = pl.pallas_call(
        _add_norm_kernel,
        out_shape=jax.ShapeDtypeStruct((n_rows, dim), x.dtype),
        grid_spec=pltpu.PrefetchScalarGridSpec(
            num_scalar_prefetch=0,
            grid=grid,
            in_specs=[
                pl.BlockSpec((tile_rows, dim), lambda i: (i, 0)),
                pl.BlockSpec((tile_rows, dim), lambda i: (i, 0)),
                pl.BlockSpec((1, dim), lambda i: (0, 0)),  # gamma: resident
                pl.BlockSpec((1, dim), lambda i: (0, 0)),  # beta:  resident
            ],
            out_specs=pl.BlockSpec((tile_rows, dim), lambda i: (i, 0)),
        ),
        compiler_params=pltpu.CompilerParams(
            dimension_semantics=("parallel",),  # shard rows across TCs on v7x
            vmem_limit_bytes=vmem_limit,
        ),
    )(x2, y2, g2, b2)

    return out.reshape(orig_shape)


if __name__ == "__main__":
    # Small but lane-dense shapes: last dim = 128 (full vreg lane width).
    batch, seq, dim = 2, 8, 128

    key = jax.random.PRNGKey(0)
    kx, ky, kg, kb = jax.random.split(key, 4)
    x = jax.random.normal(kx, (batch, seq, dim), dtype=jnp.float32)
    y = jax.random.normal(ky, (batch, seq, dim), dtype=jnp.float32)
    # nn.LayerNorm default is weight=1, bias=0; perturb deterministically so
    # the scale/shift path is exercised.
    gamma = 1.0 + 0.1 * jax.random.normal(kg, (dim,), dtype=jnp.float32)
    beta = 0.1 * jax.random.normal(kb, (dim,), dtype=jnp.float32)

    out = add_norm(x, y, gamma, beta)
    out = jax.block_until_ready(out)

    # Reference check in plain JAX (matches PyTorch LayerNorm semantics).
    s = x + y
    mu = jnp.mean(s, axis=-1, keepdims=True)
    var = jnp.mean((s - mu) ** 2, axis=-1, keepdims=True)
    ref = (s - mu) / jnp.sqrt(var + EPS) * gamma + beta
    assert jnp.allclose(out, ref, atol=2e-5, rtol=2e-5), "mismatch vs reference"

    print("KERNEL_OK")
</pallas_src>

<mosaic_0001>
module attributes {stable_mosaic.version = 11 : i64} {
  func.func @_add_norm_kernel(%arg0: i32, %arg1: memref<16x128xf32, #tpu.memory_space<vmem>>, %arg2: memref<16x128xf32, #tpu.memory_space<vmem>>, %arg3: memref<1x128xf32, #tpu.memory_space<vmem>>, %arg4: memref<1x128xf32, #tpu.memory_space<vmem>>, %arg5: memref<16x128xf32, #tpu.memory_space<vmem>>) attributes {dimension_semantics = [#tpu.dimension_semantics<parallel>], iteration_bounds = array<i64: 1>, scalar_prefetch = 0 : i64, scratch_operands = 0 : i64, tpu.core_type = #tpu.core_type<tc>, window_params = [{transform_indices = @transform_0, window_bounds = array<i64: 16, 128>}, {transform_indices = @transform_1, window_bounds = array<i64: 16, 128>}, {pipeline_mode = #tpu.pipeline_mode<synchronous>, transform_indices = @transform_2, window_bounds = array<i64: 1, 128>}, {pipeline_mode = #tpu.pipeline_mode<synchronous>, transform_indices = @transform_3, window_bounds = array<i64: 1, 128>}, {transform_indices = @transform_4, window_bounds = array<i64: 16, 128>}]} {
    %c0 = arith.constant 0 : index
    %c0_0 = arith.constant 0 : index
    %0 = vector.load %arg1[%c0, %c0_0] : memref<16x128xf32, #tpu.memory_space<vmem>>, vector<16x128xf32>
    %c0_1 = arith.constant 0 : index
    %c0_2 = arith.constant 0 : index
    %1 = vector.load %arg2[%c0_1, %c0_2] : memref<16x128xf32, #tpu.memory_space<vmem>>, vector<16x128xf32>
    %2 = arith.addf %0, %1 : vector<16x128xf32>
    %cst = arith.constant dense<0.000000e+00> : vector<16xf32>
    %3 = vector.multi_reduction <add>, %2, %cst [1] : vector<16x128xf32> to vector<16xf32>
    %4 = vector.shape_cast %3 : vector<16xf32> to vector<16x1xf32>
    %cst_3 = arith.constant 1.280000e+02 : f32
    %5 = vector.broadcast %cst_3 : f32 to vector<16x1xf32>
    %6 = arith.divf %4, %5 : vector<16x1xf32>
    %7 = arith.mulf %2, %2 : vector<16x128xf32>
    %cst_4 = arith.constant dense<0.000000e+00> : vector<16xf32>
    %8 = vector.multi_reduction <add>, %7, %cst_4 [1] : vector<16x128xf32> to vector<16xf32>
    %9 = vector.shape_cast %8 : vector<16xf32> to vector<16x1xf32>
    %cst_5 = arith.constant 1.280000e+02 : f32
    %10 = vector.broadcast %cst_5 : f32 to vector<16x1xf32>
    %11 = arith.divf %9, %10 : vector<16x1xf32>
    %12 = arith.mulf %6, %6 : vector<16x1xf32>
    %13 = arith.subf %11, %12 : vector<16x1xf32>
    %cst_6 = arith.constant 0.000000e+00 : f32
    %14 = vector.broadcast %cst_6 : f32 to vector<16x1xf32>
    %15 = arith.maximumf %13, %14 : vector<16x1xf32>
    %cst_7 = arith.constant 9.99999974E-6 : f32
    %16 = vector.broadcast %cst_7 : f32 to vector<16x1xf32>
    %17 = arith.addf %15, %16 : vector<16x1xf32>
    %18 = math.rsqrt %17 : vector<16x1xf32>
    %19 = vector.broadcast %6 : vector<16x1xf32> to vector<16x128xf32>
    %20 = arith.subf %2, %19 : vector<16x128xf32>
    %21 = vector.broadcast %18 : vector<16x1xf32> to vector<16x128xf32>
    %22 = arith.mulf %20, %21 : vector<16x128xf32>
    %c0_8 = arith.constant 0 : index
    %c0_9 = arith.constant 0 : index
    %23 = vector.load %arg3[%c0_8, %c0_9] : memref<1x128xf32, #tpu.memory_space<vmem>>, vector<1x128xf32>
    %24 = vector.broadcast %23 : vector<1x128xf32> to vector<16x128xf32>
    %25 = arith.mulf %22, %24 : vector<16x128xf32>
    %c0_10 = arith.constant 0 : index
    %c0_11 = arith.constant 0 : index
    %26 = vector.load %arg4[%c0_10, %c0_11] : memref<1x128xf32, #tpu.memory_space<vmem>>, vector<1x128xf32>
    %27 = vector.broadcast %26 : vector<1x128xf32> to vector<16x128xf32>
    %28 = arith.addf %25, %27 : vector<16x128xf32>
    %c0_12 = arith.constant 0 : index
    %c0_13 = arith.constant 0 : index
    %29 = vector.load %arg5[%c0_12, %c0_13] : memref<16x128xf32, #tpu.memory_space<vmem>>, vector<16x128xf32>
    tpu.vector_store %arg5[%c0_12, %c0_13], %28 {strides = array<i32>} : memref<16x128xf32, #tpu.memory_space<vmem>>, vector<16x128xf32>,
    return
  }
  func.func @transform_0(%arg0: i32) -> (i32, i32) {
    %c0_i32 = arith.constant 0 : i32
    %c0_i32_0 = arith.constant 0 : i32
    return %arg0, %c0_i32 : i32, i32
  }
  func.func @transform_1(%arg0: i32) -> (i32, i32) {
    %c0_i32 = arith.constant 0 : i32
    %c0_i32_0 = arith.constant 0 : i32
    return %arg0, %c0_i32 : i32, i32
  }
  func.func @transform_2(%arg0: i32) -> (i32, i32) {
    %c0_i32 = arith.constant 0 : i32
    %c0_i32_0 = arith.constant 0 : i32
    %c0_i32_1 = arith.constant 0 : i32
    return %c0_i32, %c0_i32_0 : i32, i32
  }
  func.func @transform_3(%arg0: i32) -> (i32, i32) {
    %c0_i32 = arith.constant 0 : i32
    %c0_i32_0 = arith.constant 0 : i32
    %c0_i32_1 = arith.constant 0 : i32
    return %c0_i32, %c0_i32_0 : i32, i32
  }
  func.func @transform_4(%arg0: i32) -> (i32, i32) {
    %c0_i32 = arith.constant 0 : i32
    %c0_i32_0 = arith.constant 0 : i32
    return %arg0, %c0_i32 : i32, i32
  }
}

</mosaic_0001>

<bundles_post_ra>
// kernel: tpu_custom_call.1
= control target key start
LH: loop header
LB: loop body
LE: loop exit
PB: predicated region body
PF: predicated region fallthrough
CT: control target
= control target key end

     0   :  { %9 = vsyncpa [#allocation3], 0  ;;  %s283_s0 = inlined_call_operand.hbm [shape: f32[16,128], index: 0, kind: input, shape index: {}]   ;;  %s284_s1 = inlined_call_operand.hbm [shape: f32[16,128], index: 1, kind: input, shape index: {}]   ;;  %s285_s2 = inlined_call_operand.vmem [shape: f32[1,128], index: 2, kind: input, shape index: {}]   ;;  %s286_s3 = inlined_call_operand.vmem [shape: f32[1,128], index: 3, kind: input, shape index: {}]   ;;  %s287_s4 = inlined_call_operand.hbm [shape: f32[16,128], index: 4, kind: output, shape index: {}]  }
   0x1   :  { %10 = vsyncpa [#allocation6], 0 }
   0x2   :  { %11 = vsyncpa [#allocation4], 0  ;;  %s202_s15 = smov [#allocation2]   ;;  %s130_s19 = scalar_lea.hbm %s283_s0, 256 }
   0x3   :  { %s17_s16 = sshll.u32 %s202_s15, 4  ;;  %p131_p0 = scmp.ne.s32.totalorder %s283_s0, %s130_s19  ;;  %s18_s16 = int_to_ptr.vmem [resolvable:$true] %s17_s16 }
   0x4   :  { %p134_p1 = scmp.lt.u32.totalorder %s130_s19, %s283_s0 }
   0x6   :  { %p136_p2 = pnand %p134_p1, %p131_p0 }
   0x8   :  { %139 = shalt.err (!%p136_p2)
}
   0x9   :  { %s140_s24 = scalar_lea.vmem %s18_s16, 256  ;;  %p145_p4 = scmp.lt.s32.totalorder %s18_s16, %s18_s16 }
   0xa   :  { %p141_p3 = scmp.ne.s32.totalorder %s18_s16, %s140_s24  ;;  %p146_p5 = scmp.lt.s32.totalorder %s140_s24, %s140_s24 }
   0xc   :  { %p147_p6 = por %p146_p5, %p145_p4 }
   0xe   :  { %p148_p7 = pnand %p147_p6, %p141_p3 }
  0x10   :  { %151 = shalt.err (!%p148_p7)
}
  0x11   :  { %s203_s25 = smov 128   ;;  %s204_s26 = smov 8  }
  0x12   :  { %23 = dma.hbm_to_vmem [thread:$0]  %s283_s0, 256, %s18_s16, [#allocation3], %s203_s25, %s203_s25, %s204_s26  }
  0x13   :  { %s205_s29 = smov [#allocation5]   ;;  %s152_s7 = scalar_lea.hbm %s284_s1, 256 }
  0x14   :  { %s29_s30 = sshll.u32 %s205_s29, 4  ;;  %p153_p8 = scmp.ne.s32.totalorder %s284_s1, %s152_s7  ;;  %s30_s30 = int_to_ptr.vmem [resolvable:$true] %s29_s30 }
  0x15   :  { %p156_p9 = scmp.lt.u32.totalorder %s152_s7, %s284_s1 }
  0x17   :  { %p158_p10 = pnand %p156_p9, %p153_p8 }
  0x19   :  { %161 = shalt.err (!%p158_p10)
}
  0x1a   :  { %s162_s12 = scalar_lea.vmem %s30_s30, 256  ;;  %p167_p12 = scmp.lt.s32.totalorder %s30_s30, %s30_s30 }
  0x1b   :  { %p163_p11 = scmp.ne.s32.totalorder %s30_s30, %s162_s12  ;;  %p168_p13 = scmp.lt.s32.totalorder %s162_s12, %s162_s12 }
  0x1d   :  { %p169_p0 = por %p168_p13, %p167_p12 }
  0x1f   :  { %p170_p1 = pnand %p169_p0, %p163_p11 }
  0x21   :  { %173 = shalt.err (!%p170_p1)
}
  0x22   :  { %35 = dma.hbm_to_vmem [thread:$0]  %s284_s1, 256, %s30_s30, [#allocation6], %s203_s25, %s203_s25, %s204_s26  }
  0x23   :  { %196 = dma.done.wait [#allocation3], 256  }
  0x24   :  { %197 = vsyncadd [#allocation3], 4294967040 }
  0x25   :  { %198 = dma.done.wait [#allocation6], 256  }
  0x26   :  { %199 = vsyncadd [#allocation6], 4294967040  ;;  %v46_v0 = vld [vmem:[#allocation2] sm:$0xff]  ;;  %v48_v1 = vld [vmem:[#allocation5] sm:$0xff]  ;;  %s206_s17 = smov [#allocation7]  }
  0x27   :  { %v47_v2 = vld [vmem:[#allocation2 + $0x8] sm:$0xff]  ;;  %v50_v3 = vadd.f32 %v48_v1, %v46_v0  ;;  %v49_v4 = vld [vmem:[#allocation5 + $0x8] sm:$0xff]  ;;  %v119_v26 = vld [vmem:[%s285_s2] ss:$0 sm:$0xff]  ;;  %s106_s18 = sshll.u32 %s206_s17, 4  ;;  %s107_s18 = int_to_ptr.vmem [resolvable:$true] %s106_s18 }
  0x28   :  { %v51_v5 = vadd.f32 %v49_v4, %v47_v2  ;;  %v120_v28 = vld [vmem:[%s286_s3] ss:$0 sm:$0xff]  ;;  %s174_s19 = scalar_lea.vmem %s107_s18, 256  ;;  %p179_p3 = scmp.lt.s32.totalorder %s107_s18, %s107_s18 }
  0x29   :  { %52 = vadd.xlane.f32.xlu0 %v50_v3  ;;  %v59_v6 = vmul.f32 %v50_v3, %v50_v3  ;;  %p175_p2 = scmp.ne.s32.totalorder %s107_s18, %s174_s19  ;;  %p180_p4 = scmp.lt.s32.totalorder %s174_s19, %s174_s19 }
  0x2a   :  { %v60_v7 = vmul.f32 %v51_v5, %v51_v5 }
  0x2b   :  { %61 = vadd.xlane.f32.xlu1 %v59_v6  ;;  %p181_p5 = por %p180_p4, %p179_p3 }
  0x2d   :  { %54 = vadd.xlane.f32.xlu0 %v51_v5  ;;  %p182_p6 = pnand %p181_p5, %p175_p2 }
  0x2f   :  { %63 = vadd.xlane.f32.xlu1 %v60_v7 }
  0xb6   :  { %v53_v8 = vpop.xlane.xlu0 %52 }
  0xb7   :  { %v57_v9 = vmul.f32 0.0078125, %v53_v8 }
  0xb8   :  { %v62_v10 = vpop.xlane.xlu1 %61 }
  0xb9   :  { %v67_v11 = vmul.f32 %v57_v9, %v57_v9  ;;  %v65_v12 = vmul.f32 0.0078125, %v62_v10  ;;  %v77_v24 = vsub.f32 %v50_v3, %v57_v9 }
  0xba   :  { %v55_v13 = vpop.xlane.xlu0 %54 }
  0xbb   :  { %v69_v14 = vsub.f32 %v65_v12, %v67_v11  ;;  %v58_v15 = vmul.f32 0.0078125, %v55_v13 }
  0xbc   :  { %v64_v16 = vpop.xlane.xlu1 %63 }
  0xbd   :  { %v71_v17 = vmax.f32 %v69_v14, 0.0  ;;  %v68_v18 = vmul.f32 %v58_v15, %v58_v15  ;;  %v66_v19 = vmul.f32 0.0078125, %v64_v16  ;;  %v78_v29 = vsub.f32 %v51_v5, %v58_v15 }
  0xbf   :  { %v73_v20 = vadd.f32 1e-05, %v71_v17  ;;  %v70_v21 = vsub.f32 %v66_v19, %v68_v18 }
  0xc1   :  { %126 = vrsqrt.f32 %v73_v20  ;;  %v72_v22 = vmax.f32 %v70_v21, 0.0 }
  0xc3   :  { %v74_v23 = vadd.f32 1e-05, %v72_v22 }
  0xc5   :  { %128 = vrsqrt.f32 %v74_v23 }
  0xcb   :  { %v127_v25 = vpop.eup %126 }
  0xcc   :  { %v79_v27 = vmul.f32 %v127_v25, %v77_v24 }
  0xce   :  { %v88_v30 = vmul.f32 %v119_v26, %v79_v27 }
  0xcf   :  { %v129_v31 = vpop.eup %128 }
  0xd0   :  { %v80_v32 = vmul.f32 %v129_v31, %v78_v29  ;;  %v97_v33 = vadd.f32 %v120_v28, %v88_v30 }
  0xd2   :  { %v89_v34 = vmul.f32 %v119_v26, %v80_v32  ;;  %99 = vst [vmem:[#allocation7] sm:$0xff] %v97_v33 }
  0xd4   :  { %v98_v35 = vadd.f32 %v120_v28, %v89_v34 }
  0xd6   :  { %100 = vst [vmem:[#allocation7 + $0x8] sm:$0xff] %v98_v35 }
  0xd7   :  { %185 = shalt.err (!%p182_p6)
}
  0xd8   :  { %s186_s20 = scalar_lea.hbm %s287_s4, 256 }
  0xd9   :  { %p187_p7 = scmp.ne.s32.totalorder %s287_s4, %s186_s20  ;;  %p190_p8 = scmp.lt.u32.totalorder %s186_s20, %s287_s4 }
  0xdb   :  { %p192_p9 = pnand %p190_p8, %p187_p7 }
  0xdd   :  { %195 = shalt.err (!%p192_p9)
}
  0xde   :  { %112 = dma.vmem_to_hbm [thread:$0]  %s107_s18, 256, %s287_s4, [#allocation4], %s203_s25, %s203_s25, %s204_s26  }
  0xdf   :  { %200 = dma.done.wait [#allocation4], 256  }
  0xe0   :  { %201 = vsyncadd [#allocation4], 4294967040 }
  0xe1   :  { %116 = vsyncpa [#allocation3], 1 }
  0xe2   :  { %117 = vsyncpa [#allocation6], 1 }
  0xe3   :  { %118 = vsyncpa [#allocation4], 1 }

</bundles_post_ra>
